<compile_context>
chip_gen: v6e
topology: v6e:2x2x1
jax: 0.10.0
libtpu: 0.0.40
codegen_flags: <defaults>
</compile_context>

<pallas_src>
import math

import jax
import jax.numpy as jnp
from jax.experimental import pallas as pl
from jax.experimental.pallas import tpu as pltpu

LOWPASS_FILTER_WIDTH = 6
ROLLOFF = 0.99
_HALO = 128                       # lanes of right halo streamed per time tile (>= T-1)


def make_sinc_resample_kernel(S):
    """Polyphase Hann-windowed sinc kernel, matching torchaudio's
    _get_sinc_resample_kernel after gcd reduction (orig=1, new=S)."""
    orig_freq = 1
    new_freq = int(S)
    base_freq = min(orig_freq, new_freq) * ROLLOFF                      # = 0.99
    width = math.ceil(LOWPASS_FILTER_WIDTH * orig_freq / base_freq)     # = 7
    idx = jnp.arange(-width, width + orig_freq, dtype=jnp.float32) / orig_freq
    t = jnp.arange(0, -new_freq, -1, dtype=jnp.float32)[:, None] / new_freq + idx[None, :]
    t = t * base_freq
    t = jnp.clip(t, -LOWPASS_FILTER_WIDTH, LOWPASS_FILTER_WIDTH)
    window = jnp.cos(t * math.pi / LOWPASS_FILTER_WIDTH / 2.0) ** 2
    t = t * math.pi
    scale = base_freq / orig_freq
    # NOTE: sin(t)/t evaluates 0/0 -> NaN before the where-select; the select
    # picks 1.0 so the forward value is correct (keep in mind if this is ever
    # made differentiable or rewritten with masked arithmetic).
    kernels = jnp.where(t == 0.0, jnp.float32(1.0), jnp.sin(t) / t)
    kernels = kernels * window * scale
    return kernels.astype(jnp.float32), width            # (S, T), T = 2*width + 1


def _upsample_fir_kernel(w_ref, x_ref, halo_ref, o_ref):
    # w_ref    : (S, T) polyphase taps in SMEM (cheap scalar reads).
    # x_ref    : (tBF, tL) waveform tile in VMEM.
    # halo_ref : (tBF, 128) first lanes of the *next* time tile (right halo).
    # o_ref    : (S, tBF, tL); o[s, b, i] = sum_k x[b, i + k] * w[s, k].
    S, T = w_ref.shape
    tBF, tL = x_ref.shape
    # One lane-axis concat per tile; the k-shifted windows below are static
    # lane slices of this value (the sub-128 shifts lower to XLU lane work,
    # which has slack next to the 2*T VPU mul/adds per output element).
    x = jnp.concatenate([x_ref[...], halo_ref[...]], axis=-1)   # (tBF, tL + 128)
    for s in range(S):                        # static unroll over phases
        acc = x[:, 0:tL] * w_ref[s, 0]
        for k in range(1, T):                 # static unroll over FIR taps (VPU FMAs)
            acc = acc + x[:, k:k + tL] * w_ref[s, k]
        o_ref[s, :, :] = acc                  # dense (8,128)-aligned store


def _round_up(x, m):
    return (x + m - 1) // m * m


def _choose_tiles(BF, L, S):
    """Sublane tile multiple of 8, lane tile multiple of 128; keep the
    double-buffered f32 working set (input + halo + S-phase output) <~16 MiB
    so it fits v5e's 16 MiB scoped default and v7x's 64 MiB physical VMEM."""
    tBF = min(_round_up(BF, 8), 256)
    budget_elems = (16 * 1024 * 1024) // (2 * 4)          # x2 buffers, f32
    max_tl = (budget_elems // (tBF * (S + 1))) // 128 * 128
    tL = min(_round_up(L, 128), 4096, max(128, max_tl))
    return tBF, tL


def upsample(x, S, *, tile_bf=None, tile_l=None):
    """JAX/Pallas equivalent of Upsample(S).forward(x); x: (..., L) -> (..., S*L)."""
    weights, width = make_sinc_resample_kernel(S)
    Sk, T = weights.shape
    assert T - 1 <= _HALO, "halo block must cover the FIR support"

    shape = x.shape
    L = shape[-1]
    x_flat = x.reshape(-1, L).astype(jnp.float32)
    BF = x_flat.shape[0]

    tBF, tL = _choose_tiles(BF, L, Sk)
    if tile_bf is not None:
        tBF = tile_bf
    if tile_l is not None:
        tL = tile_l
    assert tBF % 8 == 0 and tL % _HALO == 0, (tBF, tL)

    n_bf = pl.cdiv(BF, tBF)
    n_l = pl.cdiv(L, tL)
    BF_pad = n_bf * tBF
    L_pad = n_l * tL
    halo_blocks_per_tile = tL // _HALO

    # Padded waveform, width L_pad + _HALO:  xp[:, m] = x[:, m - width].
    # torchaudio right-pads with width + orig = 8; we only ever read
    # T-1-width = 7 zeros past the end for the last kept output sample and
    # everything beyond output index L*S is sliced off below, so results
    # match -- do NOT "fix" this padding to 8.
    xp = jnp.pad(
        x_flat,
        ((0, BF_pad - BF), (width, L_pad + _HALO - L - width)),
    )

    out = pl.pallas_call(
        _upsample_fir_kernel,
        out_shape=jax.ShapeDtypeStruct((Sk, BF_pad, L_pad), jnp.float32),
        grid=(n_bf, n_l),
        in_specs=[
            # polyphase taps: whole (S, T) table, resident in SMEM
            pl.BlockSpec(memory_space=pltpu.MemorySpace.SMEM),
            # main time tile
            pl.BlockSpec((tBF, tL), lambda i, j: (i, j)),
            # right halo: first 128 lanes of the next time tile (same array)
            pl.BlockSpec(
                (tBF, _HALO),
                lambda i, j: (i, (j + 1) * halo_blocks_per_tile),
            ),
        ],
        out_specs=pl.BlockSpec((Sk, tBF, tL), lambda i, j: (0, i, j)),
        compiler_params=pltpu.CompilerParams(
            dimension_semantics=("parallel", "parallel"),
            vmem_limit_bytes=32 * 1024 * 1024,
        ),
    )(weights, xp, xp)

    out = out[:, :BF, :L]                                    # (S, BF, L)
    # Element-level phase interleave: out_final[b, i*S + s] = out[s, b, i].
    out = jnp.transpose(out, (1, 2, 0)).reshape(BF, L * Sk)
    return out.reshape(shape[:-1] + (L * Sk,))


def _reference(x, S):
    """Pure-JAX reference of the same polyphase convolution (sanity check)."""
    weights, width = make_sinc_resample_kernel(S)
    Sk, T = weights.shape
    shape = x.shape
    L = shape[-1]
    xf = x.reshape(-1, L).astype(jnp.float32)
    xp = jnp.pad(xf, ((0, 0), (width, T - 1 - width)))
    cols = jnp.stack([xp[:, k:k + L] for k in range(T)], axis=-1)   # (BF, L, T)
    ref = jnp.einsum("blt,st->bsl", cols, weights)
    ref = jnp.transpose(ref, (0, 2, 1)).reshape(-1, L * Sk)
    return ref.reshape(shape[:-1] + (L * Sk,))


if __name__ == "__main__":
    k1, k2 = jax.random.split(jax.random.PRNGKey(0))

    # Case 1: small audio-like batch, default tile heuristics (single tile).
    S = 2                          # upsample factor: Resample(4096, 4096 * 2)
    B, C, L = 2, 4, 256
    x = jax.random.normal(k1, (B, C, L), dtype=jnp.float32)
    y = jax.block_until_ready(upsample(x, S))
    assert y.shape == (B, C, S * L), y.shape
    y_ref = _reference(x, S)
    assert jnp.allclose(y, y_ref, atol=1e-5, rtol=1e-5), "case 1 mismatch vs reference"

    # Case 2: force tiny tiles to exercise the multi-tile grid, the 128-lane
    # halo path and batch/time padding (BF=10 -> padded to 16, L=384 -> 3 tiles).
    S2 = 3
    B2, C2, L2 = 2, 5, 384
    x2 = jax.random.normal(k2, (B2, C2, L2), dtype=jnp.float32)
    y2 = jax.block_until_ready(upsample(x2, S2, tile_bf=8, tile_l=128))
    assert y2.shape == (B2, C2, S2 * L2), y2.shape
    y2_ref = _reference(x2, S2)
    assert jnp.allclose(y2, y2_ref, atol=1e-5, rtol=1e-5), "case 2 mismatch vs reference"

    print("KERNEL_OK")
</pallas_src>

<mosaic_0001>
module attributes {stable_mosaic.version = 11 : i64} {
  func.func @_upsample_fir_kernel(%arg0: i32, %arg1: i32, %arg2: memref<2x15xf32, #tpu.memory_space<smem>>, %arg3: memref<8x256xf32, #tpu.memory_space<vmem>>, %arg4: memref<8x128xf32, #tpu.memory_space<vmem>>, %arg5: memref<2x8x256xf32, #tpu.memory_space<vmem>>) attributes {dimension_semantics = [#tpu.dimension_semantics<parallel>, #tpu.dimension_semantics<parallel>], iteration_bounds = array<i64: 1, 1>, scalar_prefetch = 0 : i64, scratch_operands = 0 : i64, tpu.core_type = #tpu.core_type<tc>, window_params = [{transform_indices = @transform_0, window_bounds = array<i64: 2, 15>}, {transform_indices = @transform_1, window_bounds = array<i64: 8, 256>}, {transform_indices = @transform_2, window_bounds = array<i64: 8, 128>}, {transform_indices = @transform_3, window_bounds = array<i64: 2, 8, 256>}]} {
    %c0 = arith.constant 0 : index
    %c0_0 = arith.constant 0 : index
    %0 = vector.load %arg3[%c0, %c0_0] : memref<8x256xf32, #tpu.memory_space<vmem>>, vector<8x256xf32>
    %c0_1 = arith.constant 0 : index
    %c0_2 = arith.constant 0 : index
    %1 = vector.load %arg4[%c0_1, %c0_2] : memref<8x128xf32, #tpu.memory_space<vmem>>, vector<8x128xf32>
    %2 = tpu.concatenate %0, %1 in 1 : vector<8x256xf32>, vector<8x128xf32> -> vector<8x384xf32>
    %3 = vector.extract_strided_slice %2 {offsets = [0, 0], sizes = [8, 256], strides = [1, 1]} : vector<8x384xf32> to vector<8x256xf32>
    %c0_3 = arith.constant 0 : index
    %c0_4 = arith.constant 0 : index
    %4 = memref.load %arg2[%c0_3, %c0_4] : memref<2x15xf32, #tpu.memory_space<smem>>
    %5 = vector.broadcast %4 : f32 to vector<8x256xf32>
    %6 = arith.mulf %3, %5 : vector<8x256xf32>
    %7 = vector.extract_strided_slice %2 {offsets = [0, 1], sizes = [8, 256], strides = [1, 1]} : vector<8x384xf32> to vector<8x256xf32>
    %c0_5 = arith.constant 0 : index
    %c1 = arith.constant 1 : index
    %8 = memref.load %arg2[%c0_5, %c1] : memref<2x15xf32, #tpu.memory_space<smem>>
    %9 = vector.broadcast %8 : f32 to vector<8x256xf32>
    %10 = arith.mulf %7, %9 : vector<8x256xf32>
    %11 = arith.addf %6, %10 : vector<8x256xf32>
    %12 = vector.extract_strided_slice %2 {offsets = [0, 2], sizes = [8, 256], strides = [1, 1]} : vector<8x384xf32> to vector<8x256xf32>
    %c0_6 = arith.constant 0 : index
    %c2 = arith.constant 2 : index
    %13 = memref.load %arg2[%c0_6, %c2] : memref<2x15xf32, #tpu.memory_space<smem>>
    %14 = vector.broadcast %13 : f32 to vector<8x256xf32>
    %15 = arith.mulf %12, %14 : vector<8x256xf32>
    %16 = arith.addf %11, %15 : vector<8x256xf32>
    %17 = vector.extract_strided_slice %2 {offsets = [0, 3], sizes = [8, 256], strides = [1, 1]} : vector<8x384xf32> to vector<8x256xf32>
    %c0_7 = arith.constant 0 : index
    %c3 = arith.constant 3 : index
    %18 = memref.load %arg2[%c0_7, %c3] : memref<2x15xf32, #tpu.memory_space<smem>>
    %19 = vector.broadcast %18 : f32 to vector<8x256xf32>
    %20 = arith.mulf %17, %19 : vector<8x256xf32>
    %21 = arith.addf %16, %20 : vector<8x256xf32>
    %22 = vector.extract_strided_slice %2 {offsets = [0, 4], sizes = [8, 256], strides = [1, 1]} : vector<8x384xf32> to vector<8x256xf32>
    %c0_8 = arith.constant 0 : index
    %c4 = arith.constant 4 : index
    %23 = memref.load %arg2[%c0_8, %c4] : memref<2x15xf32, #tpu.memory_space<smem>>
    %24 = vector.broadcast %23 : f32 to vector<8x256xf32>
    %25 = arith.mulf %22, %24 : vector<8x256xf32>
    %26 = arith.addf %21, %25 : vector<8x256xf32>
    %27 = vector.extract_strided_slice %2 {offsets = [0, 5], sizes = [8, 256], strides = [1, 1]} : vector<8x384xf32> to vector<8x256xf32>
    %c0_9 = arith.constant 0 : index
    %c5 = arith.constant 5 : index
    %28 = memref.load %arg2[%c0_9, %c5] : memref<2x15xf32, #tpu.memory_space<smem>>
    %29 = vector.broadcast %28 : f32 to vector<8x256xf32>
    %30 = arith.mulf %27, %29 : vector<8x256xf32>
    %31 = arith.addf %26, %30 : vector<8x256xf32>
    %32 = vector.extract_strided_slice %2 {offsets = [0, 6], sizes = [8, 256], strides = [1, 1]} : vector<8x384xf32> to vector<8x256xf32>
    %c0_10 = arith.constant 0 : index
    %c6 = arith.constant 6 : index
    %33 = memref.load %arg2[%c0_10, %c6] : memref<2x15xf32, #tpu.memory_space<smem>>
    %34 = vector.broadcast %33 : f32 to vector<8x256xf32>
    %35 = arith.mulf %32, %34 : vector<8x256xf32>
    %36 = arith.addf %31, %35 : vector<8x256xf32>
    %37 = vector.extract_strided_slice %2 {offsets = [0, 7], sizes = [8, 256], strides = [1, 1]} : vector<8x384xf32> to vector<8x256xf32>
    %c0_11 = arith.constant 0 : index
    %c7 = arith.constant 7 : index
    %38 = memref.load %arg2[%c0_11, %c7] : memref<2x15xf32, #tpu.memory_space<smem>>
    %39 = vector.broadcast %38 : f32 to vector<8x256xf32>
    %40 = arith.mulf %37, %39 : vector<8x256xf32>
    %41 = arith.addf %36, %40 : vector<8x256xf32>
    %42 = vector.extract_strided_slice %2 {offsets = [0, 8], sizes = [8, 256], strides = [1, 1]} : vector<8x384xf32> to vector<8x256xf32>
    %c0_12 = arith.constant 0 : index
    %c8 = arith.constant 8 : index
    %43 = memref.load %arg2[%c0_12, %c8] : memref<2x15xf32, #tpu.memory_space<smem>>
    %44 = vector.broadcast %43 : f32 to vector<8x256xf32>
    %45 = arith.mulf %42, %44 : vector<8x256xf32>
    %46 = arith.addf %41, %45 : vector<8x256xf32>
    %47 = vector.extract_strided_slice %2 {offsets = [0, 9], sizes = [8, 256], strides = [1, 1]} : vector<8x384xf32> to vector<8x256xf32>
    %c0_13 = arith.constant 0 : index
    %c9 = arith.constant 9 : index
    %48 = memref.load %arg2[%c0_13, %c9] : memref<2x15xf32, #tpu.memory_space<smem>>
    %49 = vector.broadcast %48 : f32 to vector<8x256xf32>
    %50 = arith.mulf %47, %49 : vector<8x256xf32>
    %51 = arith.addf %46, %50 : vector<8x256xf32>
    %52 = vector.extract_strided_slice %2 {offsets = [0, 10], sizes = [8, 256], strides = [1, 1]} : vector<8x384xf32> to vector<8x256xf32>
    %c0_14 = arith.constant 0 : index
    %c10 = arith.constant 10 : index
    %53 = memref.load %arg2[%c0_14, %c10] : memref<2x15xf32, #tpu.memory_space<smem>>
    %54 = vector.broadcast %53 : f32 to vector<8x256xf32>
    %55 = arith.mulf %52, %54 : vector<8x256xf32>
    %56 = arith.addf %51, %55 : vector<8x256xf32>
    %57 = vector.extract_strided_slice %2 {offsets = [0, 11], sizes = [8, 256], strides = [1, 1]} : vector<8x384xf32> to vector<8x256xf32>
    %c0_15 = arith.constant 0 : index
    %c11 = arith.constant 11 : index
    %58 = memref.load %arg2[%c0_15, %c11] : memref<2x15xf32, #tpu.memory_space<smem>>
    %59 = vector.broadcast %58 : f32 to vector<8x256xf32>
    %60 = arith.mulf %57, %59 : vector<8x256xf32>
    %61 = arith.addf %56, %60 : vector<8x256xf32>
    %62 = vector.extract_strided_slice %2 {offsets = [0, 12], sizes = [8, 256], strides = [1, 1]} : vector<8x384xf32> to vector<8x256xf32>
    %c0_16 = arith.constant 0 : index
    %c12 = arith.constant 12 : index
    %63 = memref.load %arg2[%c0_16, %c12] : memref<2x15xf32, #tpu.memory_space<smem>>
    %64 = vector.broadcast %63 : f32 to vector<8x256xf32>
    %65 = arith.mulf %62, %64 : vector<8x256xf32>
    %66 = arith.addf %61, %65 : vector<8x256xf32>
    %67 = vector.extract_strided_slice %2 {offsets = [0, 13], sizes = [8, 256], strides = [1, 1]} : vector<8x384xf32> to vector<8x256xf32>
    %c0_17 = arith.constant 0 : index
    %c13 = arith.constant 13 : index
    %68 = memref.load %arg2[%c0_17, %c13] : memref<2x15xf32, #tpu.memory_space<smem>>
    %69 = vector.broadcast %68 : f32 to vector<8x256xf32>
    %70 = arith.mulf %67, %69 : vector<8x256xf32>
    %71 = arith.addf %66, %70 : vector<8x256xf32>
    %72 = vector.extract_strided_slice %2 {offsets = [0, 14], sizes = [8, 256], strides = [1, 1]} : vector<8x384xf32> to vector<8x256xf32>
    %c0_18 = arith.constant 0 : index
    %c14 = arith.constant 14 : index
    %73 = memref.load %arg2[%c0_18, %c14] : memref<2x15xf32, #tpu.memory_space<smem>>
    %74 = vector.broadcast %73 : f32 to vector<8x256xf32>
    %75 = arith.mulf %72, %74 : vector<8x256xf32>
    %76 = arith.addf %71, %75 : vector<8x256xf32>
    %c0_19 = arith.constant 0 : index
    %c0_20 = arith.constant 0 : index
    %c0_21 = arith.constant 0 : index
    %77 = vector.load %arg5[%c0_19, %c0_20, %c0_21] : memref<2x8x256xf32, #tpu.memory_space<vmem>>, vector<1x8x256xf32>
    %78 = vector.shape_cast %77 : vector<1x8x256xf32> to vector<8x256xf32>
    %79 = vector.shape_cast %76 : vector<8x256xf32> to vector<1x8x256xf32>
    tpu.vector_store %arg5[%c0_19, %c0_20, %c0_21], %79 {strides = array<i32>} : memref<2x8x256xf32, #tpu.memory_space<vmem>>, vector<1x8x256xf32>,
    %80 = vector.extract_strided_slice %2 {offsets = [0, 0], sizes = [8, 256], strides = [1, 1]} : vector<8x384xf32> to vector<8x256xf32>
    %c1_22 = arith.constant 1 : index
    %c0_23 = arith.constant 0 : index
    %81 = memref.load %arg2[%c1_22, %c0_23] : memref<2x15xf32, #tpu.memory_space<smem>>
    %82 = vector.broadcast %81 : f32 to vector<8x256xf32>
    %83 = arith.mulf %80, %82 : vector<8x256xf32>
    %84 = vector.extract_strided_slice %2 {offsets = [0, 1], sizes = [8, 256], strides = [1, 1]} : vector<8x384xf32> to vector<8x256xf32>
    %c1_24 = arith.constant 1 : index
    %c1_25 = arith.constant 1 : index
    %85 = memref.load %arg2[%c1_24, %c1_25] : memref<2x15xf32, #tpu.memory_space<smem>>
    %86 = vector.broadcast %85 : f32 to vector<8x256xf32>
    %87 = arith.mulf %84, %86 : vector<8x256xf32>
    %88 = arith.addf %83, %87 : vector<8x256xf32>
    %89 = vector.extract_strided_slice %2 {offsets = [0, 2], sizes = [8, 256], strides = [1, 1]} : vector<8x384xf32> to vector<8x256xf32>
    %c1_26 = arith.constant 1 : index
    %c2_27 = arith.constant 2 : index
    %90 = memref.load %arg2[%c1_26, %c2_27] : memref<2x15xf32, #tpu.memory_space<smem>>
    %91 = vector.broadcast %90 : f32 to vector<8x256xf32>
    %92 = arith.mulf %89, %91 : vector<8x256xf32>
    %93 = arith.addf %88, %92 : vector<8x256xf32>
    %94 = vector.extract_strided_slice %2 {offsets = [0, 3], sizes = [8, 256], strides = [1, 1]} : vector<8x384xf32> to vector<8x256xf32>
    %c1_28 = arith.constant 1 : index
    %c3_29 = arith.constant 3 : index
    %95 = memref.load %arg2[%c1_28, %c3_29] : memref<2x15xf32, #tpu.memory_space<smem>>
    %96 = vector.broadcast %95 : f32 to vector<8x256xf32>
    %97 = arith.mulf %94, %96 : vector<8x256xf32>
    %98 = arith.addf %93, %97 : vector<8x256xf32>
    %99 = vector.extract_strided_slice %2 {offsets = [0, 4], sizes = [8, 256], strides = [1, 1]} : vector<8x384xf32> to vector<8x256xf32>
    %c1_30 = arith.constant 1 : index
    %c4_31 = arith.constant 4 : index
    %100 = memref.load %arg2[%c1_30, %c4_31] : memref<2x15xf32, #tpu.memory_space<smem>>
    %101 = vector.broadcast %100 : f32 to vector<8x256xf32>
    %102 = arith.mulf %99, %101 : vector<8x256xf32>
    %103 = arith.addf %98, %102 : vector<8x256xf32>
    %104 = vector.extract_strided_slice %2 {offsets = [0, 5], sizes = [8, 256], strides = [1, 1]} : vector<8x384xf32> to vector<8x256xf32>
    %c1_32 = arith.constant 1 : index
    %c5_33 = arith.constant 5 : index
    %105 = memref.load %arg2[%c1_32, %c5_33] : memref<2x15xf32, #tpu.memory_space<smem>>
    %106 = vector.broadcast %105 : f32 to vector<8x256xf32>
    %107 = arith.mulf %104, %106 : vector<8x256xf32>
    %108 = arith.addf %103, %107 : vector<8x256xf32>
    %109 = vector.extract_strided_slice %2 {offsets = [0, 6], sizes = [8, 256], strides = [1, 1]} : vector<8x384xf32> to vector<8x256xf32>
    %c1_34 = arith.constant 1 : index
    %c6_35 = arith.constant 6 : index
    %110 = memref.load %arg2[%c1_34, %c6_35] : memref<2x15xf32, #tpu.memory_space<smem>>
    %111 = vector.broadcast %110 : f32 to vector<8x256xf32>
    %112 = arith.mulf %109, %111 : vector<8x256xf32>
    %113 = arith.addf %108, %112 : vector<8x256xf32>
    %114 = vector.extract_strided_slice %2 {offsets = [0, 7], sizes = [8, 256], strides = [1, 1]} : vector<8x384xf32> to vector<8x256xf32>
    %c1_36 = arith.constant 1 : index
    %c7_37 = arith.constant 7 : index
    %115 = memref.load %arg2[%c1_36, %c7_37] : memref<2x15xf32, #tpu.memory_space<smem>>
    %116 = vector.broadcast %115 : f32 to vector<8x256xf32>
    %117 = arith.mulf %114, %116 : vector<8x256xf32>
    %118 = arith.addf %113, %117 : vector<8x256xf32>
    %119 = vector.extract_strided_slice %2 {offsets = [0, 8], sizes = [8, 256], strides = [1, 1]} : vector<8x384xf32> to vector<8x256xf32>
    %c1_38 = arith.constant 1 : index
    %c8_39 = arith.constant 8 : index
    %120 = memref.load %arg2[%c1_38, %c8_39] : memref<2x15xf32, #tpu.memory_space<smem>>
    %121 = vector.broadcast %120 : f32 to vector<8x256xf32>
    %122 = arith.mulf %119, %121 : vector<8x256xf32>
    %123 = arith.addf %118, %122 : vector<8x256xf32>
    %124 = vector.extract_strided_slice %2 {offsets = [0, 9], sizes = [8, 256], strides = [1, 1]} : vector<8x384xf32> to vector<8x256xf32>
    %c1_40 = arith.constant 1 : index
    %c9_41 = arith.constant 9 : index
    %125 = memref.load %arg2[%c1_40, %c9_41] : memref<2x15xf32, #tpu.memory_space<smem>>
    %126 = vector.broadcast %125 : f32 to vector<8x256xf32>
    %127 = arith.mulf %124, %126 : vector<8x256xf32>
    %128 = arith.addf %123, %127 : vector<8x256xf32>
    %129 = vector.extract_strided_slice %2 {offsets = [0, 10], sizes = [8, 256], strides = [1, 1]} : vector<8x384xf32> to vector<8x256xf32>
    %c1_42 = arith.constant 1 : index
    %c10_43 = arith.constant 10 : index
    %130 = memref.load %arg2[%c1_42, %c10_43] : memref<2x15xf32, #tpu.memory_space<smem>>
    %131 = vector.broadcast %130 : f32 to vector<8x256xf32>
    %132 = arith.mulf %129, %131 : vector<8x256xf32>
    %133 = arith.addf %128, %132 : vector<8x256xf32>
    %134 = vector.extract_strided_slice %2 {offsets = [0, 11], sizes = [8, 256], strides = [1, 1]} : vector<8x384xf32> to vector<8x256xf32>
    %c1_44 = arith.constant 1 : index
    %c11_45 = arith.constant 11 : index
    %135 = memref.load %arg2[%c1_44, %c11_45] : memref<2x15xf32, #tpu.memory_space<smem>>
    %136 = vector.broadcast %135 : f32 to vector<8x256xf32>
    %137 = arith.mulf %134, %136 : vector<8x256xf32>
    %138 = arith.addf %133, %137 : vector<8x256xf32>
    %139 = vector.extract_strided_slice %2 {offsets = [0, 12], sizes = [8, 256], strides = [1, 1]} : vector<8x384xf32> to vector<8x256xf32>
    %c1_46 = arith.constant 1 : index
    %c12_47 = arith.constant 12 : index
    %140 = memref.load %arg2[%c1_46, %c12_47] : memref<2x15xf32, #tpu.memory_space<smem>>
    %141 = vector.broadcast %140 : f32 to vector<8x256xf32>
    %142 = arith.mulf %139, %141 : vector<8x256xf32>
    %143 = arith.addf %138, %142 : vector<8x256xf32>
    %144 = vector.extract_strided_slice %2 {offsets = [0, 13], sizes = [8, 256], strides = [1, 1]} : vector<8x384xf32> to vector<8x256xf32>
    %c1_48 = arith.constant 1 : index
    %c13_49 = arith.constant 13 : index
    %145 = memref.load %arg2[%c1_48, %c13_49] : memref<2x15xf32, #tpu.memory_space<smem>>
    %146 = vector.broadcast %145 : f32 to vector<8x256xf32>
    %147 = arith.mulf %144, %146 : vector<8x256xf32>
    %148 = arith.addf %143, %147 : vector<8x256xf32>
    %149 = vector.extract_strided_slice %2 {offsets = [0, 14], sizes = [8, 256], strides = [1, 1]} : vector<8x384xf32> to vector<8x256xf32>
    %c1_50 = arith.constant 1 : index
    %c14_51 = arith.constant 14 : index
    %150 = memref.load %arg2[%c1_50, %c14_51] : memref<2x15xf32, #tpu.memory_space<smem>>
    %151 = vector.broadcast %150 : f32 to vector<8x256xf32>
    %152 = arith.mulf %149, %151 : vector<8x256xf32>
    %153 = arith.addf %148, %152 : vector<8x256xf32>
    %c1_52 = arith.constant 1 : index
    %c0_53 = arith.constant 0 : index
    %c0_54 = arith.constant 0 : index
    %154 = vector.load %arg5[%c1_52, %c0_53, %c0_54] : memref<2x8x256xf32, #tpu.memory_space<vmem>>, vector<1x8x256xf32>
    %155 = vector.shape_cast %154 : vector<1x8x256xf32> to vector<8x256xf32>
    %156 = vector.shape_cast %153 : vector<8x256xf32> to vector<1x8x256xf32>
    tpu.vector_store %arg5[%c1_52, %c0_53, %c0_54], %156 {strides = array<i32>} : memref<2x8x256xf32, #tpu.memory_space<vmem>>, vector<1x8x256xf32>,
    return
  }
  func.func @transform_0(%arg0: i32, %arg1: i32) -> (i32, i32) {
    %c0_i32 = arith.constant 0 : i32
    %c0_i32_0 = arith.constant 0 : i32
    %c0_i32_1 = arith.constant 0 : i32
    return %c0_i32, %c0_i32_0 : i32, i32
  }
  func.func @transform_1(%arg0: i32, %arg1: i32) -> (i32, i32) {
    %c0_i32 = arith.constant 0 : i32
    return %arg0, %arg1 : i32, i32
  }
  func.func @transform_2(%arg0: i32, %arg1: i32) -> (i32, i32) {
    %c1_i32 = arith.constant 1 : i32
    %0 = arith.addi %arg1, %c1_i32 : i32
    %c2_i32 = arith.constant 2 : i32
    %1 = arith.muli %0, %c2_i32 : i32
    %c0_i32 = arith.constant 0 : i32
    return %arg0, %1 : i32, i32
  }
  func.func @transform_3(%arg0: i32, %arg1: i32) -> (i32, i32, i32) {
    %c0_i32 = arith.constant 0 : i32
    %c0_i32_0 = arith.constant 0 : i32
    return %c0_i32, %arg0, %arg1 : i32, i32, i32
  }
}

</mosaic_0001>

<bundles_post_ra>
// kernel: tpu_custom_call.1
= control target key start
LH: loop header
LB: loop body
LE: loop exit
PB: predicated region body
PF: predicated region fallthrough
CT: control target
= control target key end

     0   :  { %8 = vsyncpa [#allocation5], 0  ;;  %s1097_s0 = inlined_call_operand.hbm [shape: f32[2,15], index: 0, kind: input, shape index: {}]   ;;  %s1098_s1 = inlined_call_operand.hbm [shape: f32[8,384], index: 1, kind: input, shape index: {}]   ;;  %s1099_s2 = inlined_call_operand.hbm [shape: f32[8,384], index: 2, kind: input, shape index: {}]   ;;  %s1100_s3 = inlined_call_operand.hbm [shape: f32[2,8,256], index: 3, kind: output, shape index: {}]  }
   0x1   :  { %9 = vsyncpa [#allocation3], 0 }
   0x2   :  { %10 = vsyncpa [#allocation8], 0 }
   0x3   :  { %11 = vsyncpa [#allocation4], 0  ;;  %s794_s12 = smov [#allocation2]   ;;  %s795_s15 = smov [#allocation6]  }
   0x4   :  { %19 = dma.hbm_to_smem %s1097_s0, 32, %s794_s12, [#allocation5]  }
   0x5   :  { %s26_s16 = sshll.u32 %s795_s15, 4  ;;  %s665_s19 = scalar_lea.hbm %s1099_s2, 256  ;;  %s27_s16 = int_to_ptr.vmem [resolvable:$true] %s26_s16 }
   0x6   :  { %s731_s20 = scalar_lea.vmem %s27_s16, 256  ;;  %p736_p1 = scmp.lt.s32.totalorder %s27_s16, %s27_s16 }
   0x7   :  { %p732_p0 = scmp.ne.s32.totalorder %s27_s16, %s731_s20  ;;  %p737_p2 = scmp.lt.s32.totalorder %s731_s20, %s731_s20 }
   0x9   :  { %p738_p3 = por %p737_p2, %p736_p1 }
   0xb   :  { %p739_p4 = pnand %p738_p3, %p732_p0 }
   0xd   :  { %742 = shalt.err (!%p739_p4)
}
   0xe   :  { %29 = dma.hbm_to_vmem [thread:$0]  %s1098_s1, 256, %s27_s16, [#allocation3]  }
   0xf   :  { %s796_s23 = smov [#allocation7]  }
  0x10   :  { %s40_s0 = sshll.u32 %s796_s23, 4  ;;  %s41_s0 = int_to_ptr.vmem [resolvable:$true] %s40_s0 }
  0x11   :  { %s753_s24 = scalar_lea.vmem %s41_s0, 128  ;;  %p758_p6 = scmp.lt.s32.totalorder %s41_s0, %s41_s0 }
  0x12   :  { %p754_p5 = scmp.ne.s32.totalorder %s41_s0, %s753_s24  ;;  %p759_p7 = scmp.lt.s32.totalorder %s753_s24, %s753_s24 }
  0x14   :  { %p760_p8 = por %p759_p7, %p758_p6 }
  0x16   :  { %p761_p9 = pnand %p760_p8, %p754_p5 }
  0x18   :  { %764 = shalt.err (!%p761_p9)
}
  0x19   :  { %43 = dma.hbm_to_vmem [thread:$0]  %s665_s19, 128, %s41_s0, [#allocation8]  }
  0x1a   :  { %786 = dma.done.wait [#allocation5], 32  }
  0x1b   :  { %787 = vsyncadd [#allocation5], 4294967264 }
  0x1c   :  { %788 = dma.done.wait [#allocation3], 256  }
  0x1d   :  { %789 = vsyncadd [#allocation3], 4294967040 }
  0x1e   :  { %790 = dma.done.wait [#allocation8], 128  }
  0x1f   :  { %791 = vsyncadd [#allocation8], 4294967168 }
  0x20   :  { %53 = sfence }
  0x21   :  { %s666_s2 = sld [smem:[#allocation2 + $0x1]]  ;;  %v843_v0 = vld [vmem:[#allocation7] sm:$0xff]  ;;  %v845_v1 = vld [vmem:[#allocation6] sm:$0xff]  ;;  %v847_v3 = vld [vmem:[#allocation6 + $0x8] sm:$0xff]  ;;  %s797_s26 = smov 127   ;;  %vm77_vm0 = vcmask 1039360  }
  0x22   :  { %s667_s1 = sld [smem:[#allocation2 + $0x2]]  ;;  %s798_s28 = smov 126   ;;  %vm98_vm1 = vcmask 1031168   ;;  %vm119_vm2 = vcmask 1022976   ;;  %vm140_vm3 = vcmask 1014784   ;;  %vm161_vm4 = vcmask 1006592  }
  0x23   :  { %s668_s25 = sld [smem:[#allocation2 + $0x3]]  ;;  %s799_s30 = smov 125   ;;  %vm182_vm5 = vcmask 998400   ;;  %vm203_vm6 = vcmask 990208   ;;  %vm224_vm7 = vcmask 982016   ;;  %vm245_vm8 = vcmask 973824  }
  0x24   :  { %s669_s27 = sld [smem:[#allocation2 + $0x4]]  ;;  %s800_s5 = smov 124   ;;  %vm266_vm9 = vcmask 965632   ;;  %vm287_vm10 = vcmask 957440   ;;  %vm308_vm11 = vcmask 949248   ;;  %vm329_vm12 = vcmask 941056  }
  0x25   :  { %s670_s29 = sld [smem:[#allocation2 + $0x5]]  ;;  %s801_s8 = smov 123   ;;  %vm350_vm13 = vcmask 932864  }
  0x26   :  { %s671_s4 = sld [smem:[#allocation2 + $0x6]]  ;;  %s802_s10 = smov 122  }
  0x27   :  { %v64_v2 = vstv %s666_s2  ;;  %s672_s6 = sld [smem:[#allocation2 + $0x7]]  ;;  %s803_s12 = smov 121  }
  0x28   :  { %v67_v4 = vmul.f32 %v64_v2, %v843_v0  ;;  %v65_v5 = vmul.f32 %v64_v2, %v845_v1  ;;  %v85_v6 = vstv %s667_s1  ;;  %v66_v8 = vmul.f32 %v64_v2, %v847_v3  ;;  %s679_s7 = sld [smem:[#allocation2 + $0xe]]  ;;  %s804_s14 = smov 120  }
  0x29   :  { %v86_v7 = vmul.f32 %v85_v6, %v845_v1  ;;  %v88_v9 = vmul.f32 %v85_v6, %v843_v0  ;;  %v87_v10 = vmul.f32 %v85_v6, %v847_v3  ;;  %v106_v11 = vstv %s668_s25  ;;  %s673_s9 = sld [smem:[#allocation2 + $0x8]]  ;;  %s805_s16 = smov 119  }
  0x2a   :  { %75 = vrot.lane.b32.xlu1 %v67_v4, %s797_s26  ;;  %71 = vrot.lane.b32.xlu0 %v65_v5, %s797_s26  ;;  %v108_v12 = vmul.f32 %v106_v11, %v847_v3  ;;  %v107_v13 = vmul.f32 %v106_v11, %v845_v1  ;;  %v127_v14 = vstv %s669_s27  ;;  %v109_v16 = vmul.f32 %v106_v11, %v843_v0  ;;  %s674_s11 = sld [smem:[#allocation2 + $0x9]]  ;;  %s806_s18 = smov 118  }
  0x2b   :  { %v128_v15 = vmul.f32 %v127_v14, %v845_v1  ;;  %v130_v17 = vmul.f32 %v127_v14, %v843_v0  ;;  %v129_v18 = vmul.f32 %v127_v14, %v847_v3  ;;  %v148_v19 = vstv %s670_s29  ;;  %s675_s13 = sld [smem:[#allocation2 + $0xa]]  ;;  %s807_s20 = smov 117  }
  0x2c   :  { %v150_v20 = vmul.f32 %v148_v19, %v847_v3  ;;  %v149_v21 = vmul.f32 %v148_v19, %v845_v1  ;;  %v169_v22 = vstv %s671_s4  ;;  %v151_v24 = vmul.f32 %v148_v19, %v843_v0  ;;  %s676_s15 = sld [smem:[#allocation2 + $0xb]]  ;;  %s808_s21 = smov 116  }
  0x2d   :  { %v170_v23 = vmul.f32 %v169_v22, %v845_v1  ;;  %v172_v25 = vmul.f32 %v169_v22, %v843_v0  ;;  %v171_v26 = vmul.f32 %v169_v22, %v847_v3  ;;  %v190_v27 = vstv %s672_s6  ;;  %s677_s17 = sld [smem:[#allocation2 + $0xc]]  ;;  %s809_s0 = smov 115  }
  0x2e   :  { %92 = vrot.lane.b32.xlu1 %v86_v7, %s798_s28  ;;  %73 = vrot.lane.b32.xlu0 %v66_v8, %s797_s26  ;;  %v883_v28 = vstv %s679_s7  ;;  %v192_v30 = vmul.f32 %v190_v27, %v847_v3  ;;  %v191_v31 = vmul.f32 %v190_v27, %v845_v1  ;;  %v193_v34 = vmul.f32 %v190_v27, %v843_v0  ;;  %s678_s19 = sld [smem:[#allocation2 + $0xd]]  ;;  %s810_s24 = smov 114  }
  0x2f   :  { %v887_v29 = vmul.f32 %v883_v28, %v843_v0  ;;  %v211_v32 = vstv %s673_s9  ;;  %s681_s22 = sld [smem:[#allocation2 + $0x81]]  ;;  %v338_v56 = vmul.f32 %v883_v28, %v845_v1 }
  0x30   :  { %v212_v33 = vmul.f32 %v211_v32, %v845_v1  ;;  %v214_v35 = vmul.f32 %v211_v32, %v843_v0  ;;  %v213_v36 = vmul.f32 %v211_v32, %v847_v3  ;;  %v232_v37 = vstv %s674_s11  ;;  %s682_s23 = sld [smem:[#allocation2 + $0x82]] }
  0x31   :  { %v234_v38 = vmul.f32 %v232_v37, %v847_v3  ;;  %v233_v39 = vmul.f32 %v232_v37, %v845_v1  ;;  %v253_v40 = vstv %s675_s13  ;;  %v235_v42 = vmul.f32 %v232_v37, %v843_v0  ;;  %s683_s2 = sld [smem:[#allocation2 + $0x83]] }
  0x32   :  { %96 = vrot.lane.b32.xlu1 %v88_v9, %s798_s28  ;;  %94 = vrot.lane.b32.xlu0 %v87_v10, %s798_s28  ;;  %v254_v41 = vmul.f32 %v253_v40, %v845_v1  ;;  %v256_v43 = vmul.f32 %v253_v40, %v843_v0  ;;  %v255_v44 = vmul.f32 %v253_v40, %v847_v3  ;;  %v274_v45 = vstv %s676_s15  ;;  %s684_s1 = sld [smem:[#allocation2 + $0x84]] }
  0x33   :  { %v276_v46 = vmul.f32 %v274_v45, %v847_v3  ;;  %v275_v47 = vmul.f32 %v274_v45, %v845_v1  ;;  %v295_v48 = vstv %s677_s17  ;;  %v277_v50 = vmul.f32 %v274_v45, %v843_v0  ;;  %s685_s25 = sld [smem:[#allocation2 + $0x85]] }
  0x34   :  { %v296_v49 = vmul.f32 %v295_v48, %v845_v1  ;;  %v298_v51 = vmul.f32 %v295_v48, %v843_v0  ;;  %v297_v52 = vmul.f32 %v295_v48, %v847_v3  ;;  %v316_v53 = vstv %s678_s19  ;;  %s687_s27 = sld [smem:[#allocation2 + $0x87]] }
  0x35   :  { %v318_v54 = vmul.f32 %v316_v53, %v847_v3  ;;  %v317_v55 = vmul.f32 %v316_v53, %v845_v1  ;;  %v319_v57 = vmul.f32 %v316_v53, %v843_v0  ;;  %v364_v58 = vstv %s681_s22  ;;  %s59_s29 = sld [smem:[#allocation2]] }
  0x36   :  { %115 = vrot.lane.b32.xlu1 %v108_v12, %s799_s30  ;;  %113 = vrot.lane.b32.xlu0 %v107_v13, %s799_s30  ;;  %v366_v59 = vmul.f32 %v364_v58, %v847_v3  ;;  %v365_v60 = vmul.f32 %v364_v58, %v845_v1  ;;  %v384_v61 = vstv %s682_s23  ;;  %v367_v63 = vmul.f32 %v364_v58, %v843_v0  ;;  %s690_s4 = sld [smem:[#allocation2 + $0x8a]] }
  0x37   :  { %v385_v62 = vmul.f32 %v384_v61, %v845_v1  ;;  %v387_v2 = vmul.f32 %v384_v61, %v843_v0  ;;  %v386_v4 = vmul.f32 %v384_v61, %v847_v3  ;;  %v404_v5 = vstv %s683_s2  ;;  %s692_s6 = sld [smem:[#allocation2 + $0x8c]] }
  0x38   :  { %v406_v6 = vmul.f32 %v404_v5, %v847_v3  ;;  %v405_v7 = vmul.f32 %v404_v5, %v845_v1  ;;  %v424_v8 = vstv %s684_s1  ;;  %v407_v10 = vmul.f32 %v404_v5, %v843_v0  ;;  %s693_s7 = sld [smem:[#allocation2 + $0x8d]] }
  0x39   :  { %v425_v9 = vmul.f32 %v424_v8, %v845_v1  ;;  %v427_v11 = vmul.f32 %v424_v8, %v843_v0  ;;  %v426_v12 = vmul.f32 %v424_v8, %v847_v3  ;;  %v444_v13 = vstv %s685_s25  ;;  %s680_s9 = sld [smem:[#allocation2 + $0x80]] }
  0x3a   :  { %134 = vrot.lane.b32.xlu1 %v128_v15, %s800_s5  ;;  %117 = vrot.lane.b32.xlu0 %v109_v16, %s799_s30  ;;  %v446_v14 = vmul.f32 %v444_v13, %v847_v3  ;;  %v445_v15 = vmul.f32 %v444_v13, %v845_v1 }
  0x3b   :  { %v60_v27 = vstv %s59_s29 }
  0x3e   :  { %138 = vrot.lane.b32.xlu1 %v130_v17, %s800_s5  ;;  %136 = vrot.lane.b32.xlu0 %v129_v18, %s800_s5  ;;  %v447_v18 = vmul.f32 %v444_v13, %v843_v0 }
  0x42   :  { %157 = vrot.lane.b32.xlu1 %v150_v20, %s801_s8  ;;  %155 = vrot.lane.b32.xlu0 %v149_v21, %s801_s8  ;;  %v484_v21 = vstv %s687_s27 }
  0x43   :  { %v486_v22 = vmul.f32 %v484_v21, %v847_v3 }
  0x46   :  { %176 = vrot.lane.b32.xlu1 %v170_v23, %s802_s10  ;;  %159 = vrot.lane.b32.xlu0 %v151_v24, %s801_s8  ;;  %v485_v23 = vmul.f32 %v484_v21, %v845_v1 }
  0x4a   :  { %180 = vrot.lane.b32.xlu1 %v172_v25, %s802_s10  ;;  %178 = vrot.lane.b32.xlu0 %v171_v26, %s802_s10 }
  0x4e   :  { %199 = vrot.lane.b32.xlu1 %v192_v30, %s803_s12  ;;  %197 = vrot.lane.b32.xlu0 %v191_v31, %s803_s12  ;;  %v487_v31 = vmul.f32 %v484_v21, %v843_v0 }
  0x52   :  { %218 = vrot.lane.b32.xlu1 %v212_v33, %s804_s14  ;;  %201 = vrot.lane.b32.xlu0 %v193_v34, %s803_s12  ;;  %v62_v33 = vmul.f32 %v60_v27, %v847_v3 }
  0x56   :  { %222 = vrot.lane.b32.xlu1 %v214_v35, %s804_s14  ;;  %220 = vrot.lane.b32.xlu0 %v213_v36, %s804_s14  ;;  %v61_v35 = vmul.f32 %v60_v27, %v845_v1 }
  0x5a   :  { %241 = vrot.lane.b32.xlu1 %v234_v38, %s805_s16  ;;  %239 = vrot.lane.b32.xlu0 %v233_v39, %s805_s16 }
  0x5e   :  { %260 = vrot.lane.b32.xlu1 %v254_v41, %s806_s18  ;;  %243 = vrot.lane.b32.xlu0 %v235_v42, %s805_s16 }
  0x62   :  { %264 = vrot.lane.b32.xlu1 %v256_v43, %s806_s18  ;;  %262 = vrot.lane.b32.xlu0 %v255_v44, %s806_s18 }
  0x66   :  { %283 = vrot.lane.b32.xlu1 %v276_v46, %s807_s20  ;;  %281 = vrot.lane.b32.xlu0 %v275_v47, %s807_s20 }
  0x6a   :  { %302 = vrot.lane.b32.xlu1 %v296_v49, %s808_s21  ;;  %285 = vrot.lane.b32.xlu0 %v277_v50, %s807_s20 }
  0x6e   :  { %306 = vrot.lane.b32.xlu1 %v298_v51, %s808_s21  ;;  %304 = vrot.lane.b32.xlu0 %v297_v52, %s808_s21  ;;  %v544_v51 = vstv %s690_s4 }
  0x72   :  { %325 = vrot.lane.b32.xlu1 %v318_v54, %s809_s0  ;;  %323 = vrot.lane.b32.xlu0 %v317_v55, %s809_s0 }
  0x76   :  { %344 = vrot.lane.b32.xlu1 %v338_v56, %s810_s24  ;;  %327 = vrot.lane.b32.xlu0 %v319_v57, %s809_s0  ;;  %v545_v56 = vmul.f32 %v544_v51, %v845_v1 }
  0x7a   :  { %373 = vrot.lane.b32.xlu1 %v366_v59, %s797_s26  ;;  %371 = vrot.lane.b32.xlu0 %v365_v60, %s797_s26 }
  0x7e   :  { %391 = vrot.lane.b32.xlu1 %v385_v62, %s798_s28  ;;  %375 = vrot.lane.b32.xlu0 %v367_v63, %s797_s26  ;;  %s686_s26 = sld [smem:[#allocation2 + $0x86]]  ;;  %v547_v62 = vmul.f32 %v544_v51, %v843_v0  ;;  %v546_v63 = vmul.f32 %v544_v51, %v847_v3 }
  0x82   :  { %395 = vrot.lane.b32.xlu1 %v387_v2, %s798_s28  ;;  %393 = vrot.lane.b32.xlu0 %v386_v4, %s798_s28  ;;  %s688_s28 = sld [smem:[#allocation2 + $0x88]] }
  0x84   :  { %v464_v16 = vstv %s686_s26 }
  0x85   :  { %v465_v17 = vmul.f32 %v464_v16, %v845_v1  ;;  %v467_v19 = vmul.f32 %v464_v16, %v843_v0  ;;  %v466_v20 = vmul.f32 %v464_v16, %v847_v3 }
  0x86   :  { %413 = vrot.lane.b32.xlu1 %v406_v6, %s799_s30  ;;  %411 = vrot.lane.b32.xlu0 %v405_v7, %s799_s30 }
  0x88   :  { %v504_v24 = vstv %s688_s28 }
  0x89   :  { %v505_v30 = vmul.f32 %v504_v24, %v845_v1  ;;  %v507_v38 = vmul.f32 %v504_v24, %v843_v0  ;;  %v506_v39 = vmul.f32 %v504_v24, %v847_v3 }
  0x8a   :  { %431 = vrot.lane.b32.xlu1 %v425_v9, %s800_s5  ;;  %415 = vrot.lane.b32.xlu0 %v407_v10, %s799_s30  ;;  %s689_s30 = sld [smem:[#allocation2 + $0x89]] }
  0x8e   :  { %435 = vrot.lane.b32.xlu1 %v427_v11, %s800_s5  ;;  %433 = vrot.lane.b32.xlu0 %v426_v12, %s800_s5  ;;  %s691_s5 = sld [smem:[#allocation2 + $0x8b]]  ;;  %v584_v12 = vstv %s692_s6 }
  0x8f   :  { %v586_v24 = vmul.f32 %v584_v12, %v847_v3 }
  0x90   :  { %v524_v40 = vstv %s689_s30 }
  0x91   :  { %v526_v47 = vmul.f32 %v524_v40, %v847_v3  ;;  %v525_v50 = vmul.f32 %v524_v40, %v845_v1  ;;  %v527_v57 = vmul.f32 %v524_v40, %v843_v0  ;;  %v339_v40 = vmul.f32 %v883_v28, %v847_v3 }
  0x92   :  { %453 = vrot.lane.b32.xlu1 %v446_v14, %s801_s8  ;;  %451 = vrot.lane.b32.xlu0 %v445_v15, %s801_s8 }
  0x94   :  { %v564_v2 = vstv %s691_s5 }
  0x95   :  { %v566_v8 = vmul.f32 %v564_v2, %v847_v3  ;;  %v565_v11 = vmul.f32 %v564_v2, %v845_v1 }
  0x96   :  { %471 = vrot.lane.b32.xlu1 %v465_v17, %s802_s10  ;;  %455 = vrot.lane.b32.xlu0 %v447_v18, %s801_s8  ;;  %v585_v17 = vmul.f32 %v584_v12, %v845_v1  ;;  %v567_v18 = vmul.f32 %v564_v2, %v843_v0  ;;  %s694_s8 = sld [smem:[#allocation2 + $0x8e]] }
  0x9a   :  { %475 = vrot.lane.b32.xlu1 %v467_v19, %s802_s10  ;;  %473 = vrot.lane.b32.xlu0 %v466_v20, %s802_s10  ;;  %s811_s10 = smov [#allocation9]  }
  0x9b   :  { %s651_s11 = sshll.u32 %s811_s10, 4  ;;  %s652_s11 = int_to_ptr.vmem [resolvable:$true] %s651_s11 }
  0x9c   :  { %v76_v25 = vpop.permute.xlu1 %75  ;;  %v72_v26 = vpop.permute.xlu0 %71  ;;  %p771_p11 = scmp.lt.s32.totalorder %s652_s11, %s652_s11 }
  0x9e   :  { %493 = vrot.lane.b32.xlu1 %v486_v22, %s803_s12  ;;  %491 = vrot.lane.b32.xlu0 %v485_v23, %s803_s12  ;;  %v587_v23 = vmul.f32 %v584_v12, %v843_v0 }
  0xa0   :  { %v93_v32 = vpop.permute.xlu1 %92  ;;  %v74_v34 = vpop.permute.xlu0 %73 }
  0xa1   :  { %v78_v36 = vsel %vm77_vm0, %v72_v26, %v74_v34  ;;  %v79_v37 = vsel %vm77_vm0, %v74_v34, %v76_v25  ;;  %v604_v25 = vstv %s693_s7 }
  0xa2   :  { %511 = vrot.lane.b32.xlu1 %v505_v30, %s804_s14  ;;  %495 = vrot.lane.b32.xlu0 %v487_v31, %s803_s12  ;;  %v82_v41 = vadd.f32 %v78_v36, %v61_v35  ;;  %v83_v42 = vadd.f32 %v79_v37, %v62_v33  ;;  %v605_v35 = vmul.f32 %v604_v25, %v845_v1  ;;  %s766_s12 = scalar_lea.vmem %s652_s11, 512 }
  0xa3   :  { %p767_p10 = scmp.ne.s32.totalorder %s652_s11, %s766_s12  ;;  %p772_p12 = scmp.lt.s32.totalorder %s766_s12, %s766_s12 }
  0xa4   :  { %v97_v43 = vpop.permute.xlu1 %96  ;;  %v95_v44 = vpop.permute.xlu0 %94 }
  0xa5   :  { %v99_v45 = vsel %vm98_vm1, %v93_v32, %v95_v44  ;;  %v100_v46 = vsel %vm98_vm1, %v95_v44, %v97_v43  ;;  %v606_v32 = vmul.f32 %v604_v25, %v847_v3  ;;  %p773_p13 = por %p772_p12, %p771_p11 }
  0xa6   :  { %v103_v48 = vadd.f32 %v99_v45, %v82_v41  ;;  %v104_v49 = vadd.f32 %v100_v46, %v83_v42  ;;  %515 = vrot.lane.b32.xlu1 %v507_v38, %s804_s14  ;;  %513 = vrot.lane.b32.xlu0 %v506_v39, %s804_s14  ;;  %v607_v41 = vmul.f32 %v604_v25, %v843_v0  ;;  %v624_v42 = vstv %s694_s8 }
  0xa7   :  { %v627_v51 = vmul.f32 %v624_v42, %v843_v0  ;;  %p774_p0 = pnand %p773_p13, %p767_p10 }
  0xa8   :  { %v116_v52 = vpop.permute.xlu1 %115  ;;  %v114_v53 = vpop.permute.xlu0 %113 }
  0xa9   :  { %v120_v54 = vsel %vm119_vm2, %v114_v53, %v116_v52 }
  0xaa   :  { %v124_v55 = vadd.f32 %v120_v54, %v103_v48  ;;  %533 = vrot.lane.b32.xlu1 %v526_v47, %s805_s16  ;;  %531 = vrot.lane.b32.xlu0 %v525_v50, %s805_s16  ;;  %v625_v47 = vmul.f32 %v624_v42, %v845_v1  ;;  %v626_v54 = vmul.f32 %v624_v42, %v847_v3 }
  0xac   :  { %v135_v58 = vpop.permute.xlu1 %134  ;;  %v118_v59 = vpop.permute.xlu0 %117 }
  0xad   :  { %v121_v60 = vsel %vm119_vm2, %v116_v52, %v118_v59 }
  0xae   :  { %v125_v61 = vadd.f32 %v121_v60, %v104_v49  ;;  %551 = vrot.lane.b32.xlu1 %v545_v56, %s806_s18  ;;  %535 = vrot.lane.b32.xlu0 %v527_v57, %s805_s16 }
  0xb0   :  { %v139_v4 = vpop.permute.xlu1 %138  ;;  %v137_v5 = vpop.permute.xlu0 %136 }
  0xb1   :  { %v141_v6 = vsel %vm140_vm3, %v135_v58, %v137_v5  ;;  %v142_v7 = vsel %vm140_vm3, %v137_v5, %v139_v4 }
  0xb2   :  { %v145_v9 = vadd.f32 %v141_v6, %v124_v55  ;;  %v146_v10 = vadd.f32 %v142_v7, %v125_v61  ;;  %555 = vrot.lane.b32.xlu1 %v547_v62, %s806_s18  ;;  %553 = vrot.lane.b32.xlu0 %v546_v63, %s806_s18 }
  0xb4   :  { %v158_v13 = vpop.permute.xlu1 %157  ;;  %v156_v14 = vpop.permute.xlu0 %155 }
  0xb5   :  { %v162_v15 = vsel %vm161_vm4, %v156_v14, %v158_v13 }
  0xb6   :  { %v166_v16 = vadd.f32 %v162_v15, %v145_v9  ;;  %573 = vrot.lane.b32.xlu1 %v566_v8, %s807_s20  ;;  %571 = vrot.lane.b32.xlu0 %v565_v11, %s807_s20 }
  0xb8   :  { %v177_v19 = vpop.permute.xlu1 %176  ;;  %v160_v20 = vpop.permute.xlu0 %159 }
  0xb9   :  { %v163_v21 = vsel %vm161_vm4, %v158_v13, %v160_v20 }
  0xba   :  { %v167_v22 = vadd.f32 %v163_v21, %v146_v10  ;;  %591 = vrot.lane.b32.xlu1 %v585_v17, %s808_s21  ;;  %575 = vrot.lane.b32.xlu0 %v567_v18, %s807_s20 }
  0xbc   :  { %v181_v26 = vpop.permute.xlu1 %180  ;;  %v179_v27 = vpop.permute.xlu0 %178 }
  0xbd   :  { %v183_v30 = vsel %vm182_vm5, %v177_v19, %v179_v27  ;;  %v184_v31 = vsel %vm182_vm5, %v179_v27, %v181_v26 }
  0xbe   :  { %v187_v33 = vadd.f32 %v183_v30, %v166_v16  ;;  %v188_v34 = vadd.f32 %v184_v31, %v167_v22  ;;  %595 = vrot.lane.b32.xlu1 %v587_v23, %s808_s21  ;;  %593 = vrot.lane.b32.xlu0 %v586_v24, %s808_s21 }
  0xc0   :  { %v200_v36 = vpop.permute.xlu1 %199  ;;  %v198_v37 = vpop.permute.xlu0 %197 }
  0xc1   :  { %v204_v38 = vsel %vm203_vm6, %v198_v37, %v200_v36 }
  0xc2   :  { %v208_v39 = vadd.f32 %v204_v38, %v187_v33  ;;  %613 = vrot.lane.b32.xlu1 %v606_v32, %s809_s0  ;;  %611 = vrot.lane.b32.xlu0 %v605_v35, %s809_s0 }
  0xc4   :  { %v219_v43 = vpop.permute.xlu1 %218  ;;  %v202_v44 = vpop.permute.xlu0 %201 }
  0xc5   :  { %v205_v45 = vsel %vm203_vm6, %v200_v36, %v202_v44 }
  0xc6   :  { %v209_v46 = vadd.f32 %v205_v45, %v188_v34  ;;  %346 = vrot.lane.b32.xlu1 %v339_v40, %s810_s24  ;;  %615 = vrot.lane.b32.xlu0 %v607_v41, %s809_s0 }
  0xc8   :  { %v223_v48 = vpop.permute.xlu1 %222  ;;  %v221_v49 = vpop.permute.xlu0 %220 }
  0xc9   :  { %v225_v50 = vsel %vm224_vm7, %v219_v43, %v221_v49  ;;  %v226_v28 = vsel %vm224_vm7, %v221_v49, %v223_v48 }
  0xca   :  { %v229_v52 = vadd.f32 %v225_v50, %v208_v39  ;;  %v230_v53 = vadd.f32 %v226_v28, %v209_v46  ;;  %631 = vrot.lane.b32.xlu1 %v625_v47, %s810_s24  ;;  %348 = vrot.lane.b32.xlu0 %v887_v29, %s810_s24 }
  0xcc   :  { %v242_v55 = vpop.permute.xlu1 %241  ;;  %v240_v56 = vpop.permute.xlu0 %239 }
  0xcd   :  { %v246_v57 = vsel %vm245_vm8, %v240_v56, %v242_v55 }
  0xce   :  { %v250_v58 = vadd.f32 %v246_v57, %v229_v52  ;;  %635 = vrot.lane.b32.xlu1 %v627_v51, %s810_s24  ;;  %633 = vrot.lane.b32.xlu0 %v626_v54, %s810_s24  ;;  %v360_v57 = vstv %s680_s9 }
  0xd0   :  { %v261_v0 = vpop.permute.xlu1 %260  ;;  %v244_v59 = vpop.permute.xlu0 %243 }
  0xd1   :  { %v247_v60 = vsel %vm245_vm8, %v242_v55, %v244_v59 }
  0xd2   :  { %v251_v61 = vadd.f32 %v247_v60, %v230_v53 }
  0xd4   :  { %v265_v62 = vpop.permute.xlu1 %264  ;;  %v263_v29 = vpop.permute.xlu0 %262 }
  0xd5   :  { %v267_v63 = vsel %vm266_vm9, %v261_v0, %v263_v29  ;;  %v268_v2 = vsel %vm266_vm9, %v263_v29, %v265_v62  ;;  %v362_v0 = vmul.f32 %v360_v57, %v847_v3 }
  0xd6   :  { %v271_v4 = vadd.f32 %v267_v63, %v250_v58  ;;  %v272_v5 = vadd.f32 %v268_v2, %v251_v61  ;;  %v361_v58 = vmul.f32 %v360_v57, %v845_v1 }
  0xd8   :  { %v284_v6 = vpop.permute.xlu1 %283  ;;  %v282_v7 = vpop.permute.xlu0 %281 }
  0xd9   :  { %v288_v8 = vsel %vm287_vm10, %v282_v7, %v284_v6 }
  0xda   :  { %v292_v9 = vadd.f32 %v288_v8, %v271_v4 }
  0xdc   :  { %v303_v10 = vpop.permute.xlu1 %302  ;;  %v286_v11 = vpop.permute.xlu0 %285 }
  0xdd   :  { %v289_v12 = vsel %vm287_vm10, %v284_v6, %v286_v11 }
  0xde   :  { %v293_v13 = vadd.f32 %v289_v12, %v272_v5 }
  0xe0   :  { %v307_v14 = vpop.permute.xlu1 %306  ;;  %v305_v15 = vpop.permute.xlu0 %304 }
  0xe1   :  { %v309_v16 = vsel %vm308_vm11, %v303_v10, %v305_v15  ;;  %v310_v17 = vsel %vm308_vm11, %v305_v15, %v307_v14 }
  0xe2   :  { %v313_v18 = vadd.f32 %v309_v16, %v292_v9  ;;  %v314_v19 = vadd.f32 %v310_v17, %v293_v13 }
  0xe4   :  { %v326_v20 = vpop.permute.xlu1 %325  ;;  %v324_v21 = vpop.permute.xlu0 %323 }
  0xe5   :  { %v330_v22 = vsel %vm329_vm12, %v324_v21, %v326_v20 }
  0xe6   :  { %v1052_v23 = vadd.f32 %v330_v22, %v313_v18 }
  0xe8   :  { %v1054_v24 = vpop.permute.xlu1 %344  ;;  %v328_v25 = vpop.permute.xlu0 %327 }
  0xe9   :  { %v331_v26 = vsel %vm329_vm12, %v326_v20, %v328_v25 }
  0xea   :  { %v1057_v27 = vadd.f32 %v331_v26, %v314_v19 }
  0xec   :  { %v374_v30 = vpop.permute.xlu1 %373  ;;  %v372_v31 = vpop.permute.xlu0 %371 }
  0xed   :  { %v377_v61 = vsel %vm77_vm0, %v372_v31, %v374_v30 }
  0xee   :  { %v381_v2 = vadd.f32 %v377_v61, %v361_v58 }
  0xf0   :  { %v392_v32 = vpop.permute.xlu1 %391  ;;  %v376_v33 = vpop.permute.xlu0 %375 }
  0xf1   :  { %v378_v62 = vsel %vm77_vm0, %v374_v30, %v376_v33 }
  0xf2   :  { %v382_v4 = vadd.f32 %v378_v62, %v362_v0 }
  0xf4   :  { %v396_v34 = vpop.permute.xlu1 %395  ;;  %v394_v35 = vpop.permute.xlu0 %393 }
  0xf5   :  { %v397_v29 = vsel %vm98_vm1, %v392_v32, %v394_v35  ;;  %v398_v63 = vsel %vm98_vm1, %v394_v35, %v396_v34 }
  0xf6   :  { %v401_v8 = vadd.f32 %v397_v29, %v381_v2  ;;  %v402_v3 = vadd.f32 %v398_v63, %v382_v4 }
  0xf8   :  { %v414_v36 = vpop.permute.xlu1 %413  ;;  %v412_v37 = vpop.permute.xlu0 %411 }
  0xf9   :  { %v417_v7 = vsel %vm119_vm2, %v412_v37, %v414_v36 }
  0xfa   :  { %v421_v11 = vadd.f32 %v417_v7, %v401_v8 }
  0xfc   :  { %v432_v38 = vpop.permute.xlu1 %431  ;;  %v416_v39 = vpop.permute.xlu0 %415 }
  0xfd   :  { %v418_v1 = vsel %vm119_vm2, %v414_v36, %v416_v39 }
  0xfe   :  { %v422_v12 = vadd.f32 %v418_v1, %v402_v3 }
 0x100   :  { %v436_v40 = vpop.permute.xlu1 %435  ;;  %v434_v41 = vpop.permute.xlu0 %433 }
 0x101   :  { %v437_v9 = vsel %vm140_vm3, %v432_v38, %v434_v41  ;;  %v438_v10 = vsel %vm140_vm3, %v434_v41, %v436_v40 }
 0x102   :  { %v441_v17 = vadd.f32 %v437_v9, %v421_v11  ;;  %v442_v18 = vadd.f32 %v438_v10, %v422_v12 }
 0x104   :  { %v454_v42 = vpop.permute.xlu1 %453  ;;  %v452_v43 = vpop.permute.xlu0 %451 }
 0x105   :  { %v457_v15 = vsel %vm161_vm4, %v452_v43, %v454_v42 }
 0x106   :  { %v461_v21 = vadd.f32 %v457_v15, %v441_v17 }
 0x108   :  { %v472_v44 = vpop.permute.xlu1 %471  ;;  %v456_v45 = vpop.permute.xlu0 %455 }
 0x109   :  { %v458_v16 = vsel %vm161_vm4, %v454_v42, %v456_v45 }
 0x10a   :  { %v462_v22 = vadd.f32 %v458_v16, %v442_v18 }
 0x10c   :  { %v476_v46 = vpop.permute.xlu1 %475  ;;  %v474_v47 = vpop.permute.xlu0 %473 }
 0x10d   :  { %v477_v19 = vsel %vm182_vm5, %v472_v44, %v474_v47  ;;  %v478_v20 = vsel %vm182_vm5, %v474_v47, %v476_v46 }
 0x10e   :  { %v481_v32 = vadd.f32 %v477_v19, %v461_v21  ;;  %v482_v33 = vadd.f32 %v478_v20, %v462_v22 }
 0x110   :  { %v494_v48 = vpop.permute.xlu1 %493  ;;  %v492_v49 = vpop.permute.xlu0 %491 }
 0x111   :  { %v497_v30 = vsel %vm203_vm6, %v492_v49, %v494_v48 }
 0x112   :  { %v501_v36 = vadd.f32 %v497_v30, %v481_v32 }
 0x114   :  { %v512_v50 = vpop.permute.xlu1 %511  ;;  %v496_v28 = vpop.permute.xlu0 %495 }
 0x115   :  { %v498_v31 = vsel %vm203_vm6, %v494_v48, %v496_v28 }
 0x116   :  { %v502_v37 = vadd.f32 %v498_v31, %v482_v33 }
 0x118   :  { %v516_v51 = vpop.permute.xlu1 %515  ;;  %v514_v52 = vpop.permute.xlu0 %513 }
 0x119   :  { %v517_v34 = vsel %vm224_vm7, %v512_v50, %v514_v52  ;;  %v518_v35 = vsel %vm224_vm7, %v514_v52, %v516_v51 }
 0x11a   :  { %v521_v42 = vadd.f32 %v517_v34, %v501_v36  ;;  %v522_v43 = vadd.f32 %v518_v35, %v502_v37 }
 0x11c   :  { %v534_v53 = vpop.permute.xlu1 %533  ;;  %v532_v54 = vpop.permute.xlu0 %531 }
 0x11d   :  { %v537_v40 = vsel %vm245_vm8, %v532_v54, %v534_v53 }
 0x11e   :  { %v541_v46 = vadd.f32 %v537_v40, %v521_v42 }
 0x120   :  { %v552_v55 = vpop.permute.xlu1 %551  ;;  %v536_v56 = vpop.permute.xlu0 %535 }
 0x121   :  { %v538_v41 = vsel %vm245_vm8, %v534_v53, %v536_v56 }
 0x122   :  { %v542_v47 = vadd.f32 %v538_v41, %v522_v43 }
 0x124   :  { %v556_v59 = vpop.permute.xlu1 %555  ;;  %v554_v60 = vpop.permute.xlu0 %553 }
 0x125   :  { %v557_v44 = vsel %vm266_vm9, %v552_v55, %v554_v60  ;;  %v558_v45 = vsel %vm266_vm9, %v554_v60, %v556_v59 }
 0x126   :  { %v561_v52 = vadd.f32 %v557_v44, %v541_v46  ;;  %v562_v53 = vadd.f32 %v558_v45, %v542_v47 }
 0x128   :  { %v574_v5 = vpop.permute.xlu1 %573  ;;  %v572_v6 = vpop.permute.xlu0 %571 }
 0x129   :  { %v577_v50 = vsel %vm287_vm10, %v572_v6, %v574_v5 }
 0x12a   :  { %v581_v57 = vadd.f32 %v577_v50, %v561_v52 }
 0x12c   :  { %v592_v13 = vpop.permute.xlu1 %591  ;;  %v576_v14 = vpop.permute.xlu0 %575 }
 0x12d   :  { %v578_v28 = vsel %vm287_vm10, %v574_v5, %v576_v14 }
 0x12e   :  { %v582_v58 = vadd.f32 %v578_v28, %v562_v53 }
 0x130   :  { %v596_v25 = vpop.permute.xlu1 %595  ;;  %v594_v26 = vpop.permute.xlu0 %593 }
 0x131   :  { %v597_v56 = vsel %vm308_vm11, %v592_v13, %v594_v26  ;;  %v598_v55 = vsel %vm308_vm11, %v594_v26, %v596_v25 }
 0x132   :  { %v602_v29 = vadd.f32 %v598_v55, %v582_v58 }
 0x134   :  { %v614_v38 = vpop.permute.xlu1 %613  ;;  %v612_v39 = vpop.permute.xlu0 %611 }
 0x135   :  { %v617_v60 = vsel %vm329_vm12, %v612_v39, %v614_v38 }
 0x138   :  { %v347_v48 = vpop.permute.xlu1 %346  ;;  %v616_v49 = vpop.permute.xlu0 %615 }
 0x139   :  { %v351_v51 = vsel %vm350_vm13, %v1054_v24, %v347_v48  ;;  %v618_v61 = vsel %vm329_vm12, %v614_v38, %v616_v49  ;;  %v601_v24 = vadd.f32 %v597_v56, %v581_v57 }
 0x13a   :  { %v355_v54 = vadd.f32 %v351_v51, %v1052_v23  ;;  %v622_v2 = vadd.f32 %v618_v61, %v602_v29 }
 0x13b   :  { %v621_v23 = vadd.f32 %v617_v60, %v601_v24 }
 0x13c   :  { %357 = vst [vmem:[#allocation9] sm:$0xff] %v355_v54  ;;  %v632_v0 = vpop.permute.xlu1 %631  ;;  %v349_v59 = vpop.permute.xlu0 %348 }
 0x13d   :  { %v352_v62 = vsel %vm350_vm13, %v347_v48, %v349_v59 }
 0x13e   :  { %v356_v63 = vadd.f32 %v352_v62, %v1057_v27 }
 0x140   :  { %358 = vst [vmem:[#allocation9 + $0x8] sm:$0xff] %v356_v63  ;;  %v636_v4 = vpop.permute.xlu1 %635  ;;  %v634_v5 = vpop.permute.xlu0 %633 }
 0x141   :  { %v637_v6 = vsel %vm350_vm13, %v632_v0, %v634_v5  ;;  %v638_v7 = vsel %vm350_vm13, %v634_v5, %v636_v4 }
 0x142   :  { %v641_v1 = vadd.f32 %v637_v6, %v621_v23  ;;  %v642_v8 = vadd.f32 %v638_v7, %v622_v2 }
 0x144   :  { %644 = vst [vmem:[#allocation9 + $0x10] sm:$0xff] %v641_v1  ;;  %645 = vst [vmem:[#allocation9 + $0x18] sm:$0xff] %v642_v8 }
 0x145   :  { %777 = shalt.err (!%p774_p0)
}
 0x146   :  { %s812_s13 = smov 256   ;;  %s813_s14 = smov 16  }
 0x147   :  { %657 = dma.vmem_to_hbm [thread:$0]  %s652_s11, 512, %s1100_s3, [#allocation4], %s812_s13, %s812_s13, %s813_s14  }
 0x148   :  { %792 = dma.done.wait [#allocation4], 512  }
 0x149   :  { %793 = vsyncadd [#allocation4], 4294966784 }
 0x14a   :  { %661 = vsyncpa [#allocation3], 1 }
 0x14b   :  { %662 = vsyncpa [#allocation8], 1 }
 0x14c   :  { %663 = vsyncpa [#allocation4], 1 }
 0x14d   :  { %664 = vsyncpa [#allocation5], 1 }

</bundles_post_ra>
